<compile_context>
chip_gen: v5e
topology: v5e:2x2
jax: 0.10.0
libtpu: 0.0.40
codegen_flags: <defaults>
</compile_context>

<pallas_src>
import functools

import jax
import jax.numpy as jnp
from jax.experimental import pallas as pl
from jax.experimental.pallas import tpu as pltpu


def _round_up(x: int, m: int) -> int:
    return ((x + m - 1) // m) * m


def _mlp_kernel(x_ref, w1_ref, b1_ref, w2_ref, b2_ref, o_ref):
    # hidden = sigmoid(x @ W1 + b1)       -- MXU matmul, f32 accumulate
    h = jnp.dot(x_ref[...], w1_ref[...], preferred_element_type=jnp.float32)
    h = jax.nn.sigmoid(h + b1_ref[...])                 # (TILE_B, 256)
    # out = hidden @ W2_padded + b2_padded  -- lane-dense (TILE_B, C_pad)
    out = jnp.dot(h, w2_ref[...], preferred_element_type=jnp.float32)
    o_ref[...] = (out + b2_ref[...]).astype(o_ref.dtype)


@functools.partial(jax.jit, static_argnames=("tile_b",))
def network_forward(x, w1, b1, w2, b2, *, tile_b=512):
    """x: (B, input_size) f32; returns (B, number_of_classes) f32.

    w1: (input_size, 256), b1: (1, 256)
    w2: (256, number_of_classes), b2: (1, number_of_classes)
    """
    batch, in_size = x.shape
    hidden = w1.shape[1]
    num_classes = w2.shape[1]

    # --- lane-dense output padding (classes -> multiple of 128) ------------
    c_pad = _round_up(max(num_classes, 128), 128)
    if c_pad != num_classes:
        w2 = jnp.pad(w2, ((0, 0), (0, c_pad - num_classes)))
        b2 = jnp.pad(b2, ((0, 0), (0, c_pad - num_classes)))

    # --- batch tiling -------------------------------------------------------
    # TILE_B=512 keeps (2x double-buffered x/out tiles + resident weights +
    # the (TILE_B, 256) f32 hidden intermediate) well under the default scoped
    # VMEM limit on all of v5e/v6e/v7x.
    tile_b = min(tile_b, _round_up(batch, 8))
    b_pad = _round_up(batch, tile_b)
    if b_pad != batch:
        x = jnp.pad(x, ((0, b_pad - batch), (0, 0)))

    grid = (b_pad // tile_b,)

    flops = 2 * b_pad * (in_size * hidden + hidden * c_pad)
    bytes_accessed = (
        b_pad * in_size * 4 + b_pad * c_pad * 4          # x in, out
        + in_size * hidden * 4 + hidden * 4              # w1, b1
        + hidden * c_pad * 4 + c_pad * 4                 # w2, b2
    )
    transcendentals = b_pad * hidden                     # logistic in sigmoid

    out = pl.pallas_call(
        _mlp_kernel,
        out_shape=jax.ShapeDtypeStruct((b_pad, c_pad), jnp.float32),
        grid=grid,
        in_specs=[
            pl.BlockSpec((tile_b, in_size), lambda i: (i, 0)),   # x: tiled
            pl.BlockSpec((in_size, hidden), lambda i: (0, 0)),   # w1: resident
            pl.BlockSpec((1, hidden),       lambda i: (0, 0)),   # b1: resident
            pl.BlockSpec((hidden, c_pad),   lambda i: (0, 0)),   # w2: resident
            pl.BlockSpec((1, c_pad),        lambda i: (0, 0)),   # b2: resident
        ],
        out_specs=pl.BlockSpec((tile_b, c_pad), lambda i: (i, 0)),
        compiler_params=pltpu.CompilerParams(
            dimension_semantics=("parallel",),   # shard batch across TCs (v7x)
        ),
        cost_estimate=pl.CostEstimate(
            flops=flops,
            transcendentals=transcendentals,
            bytes_accessed=bytes_accessed,
        ),
    )(x, w1, b1, w2, b2)

    # Strip the batch / class padding.
    return out[:batch, :num_classes]


def init_params(key, input_size, hidden_size, number_of_classes):
    """Deterministic init mimicking PyTorch nn.Linear defaults
    (uniform(-1/sqrt(fan_in), 1/sqrt(fan_in)))."""
    k1, k2, k3, k4 = jax.random.split(key, 4)
    bound1 = 1.0 / jnp.sqrt(jnp.float32(input_size))
    bound2 = 1.0 / jnp.sqrt(jnp.float32(hidden_size))
    # Stored as (in_features, out_features): transpose of PyTorch weight layout.
    w1 = jax.random.uniform(k1, (input_size, hidden_size), jnp.float32,
                            -bound1, bound1)
    b1 = jax.random.uniform(k2, (1, hidden_size), jnp.float32, -bound1, bound1)
    w2 = jax.random.uniform(k3, (hidden_size, number_of_classes), jnp.float32,
                            -bound2, bound2)
    b2 = jax.random.uniform(k4, (1, number_of_classes), jnp.float32,
                            -bound2, bound2)
    return w1, b1, w2, b2
    # TODO(synk): optionally store w1/w2 in bfloat16 (f32 accumulate) to halve
    # HBM weight traffic for large-batch inference; kept f32 for tolerance.


if __name__ == "__main__":
    key = jax.random.PRNGKey(0)
    batch = 8
    input_size = 32
    hidden_size = 256
    number_of_classes = 10

    kx, kp = jax.random.split(key)
    x = jax.random.normal(kx, (batch, input_size), jnp.float32)
    w1, b1, w2, b2 = init_params(kp, input_size, hidden_size, number_of_classes)

    out = network_forward(x, w1, b1, w2, b2)
    jax.block_until_ready(out)

    # Reference check in plain JAX (same math as the PyTorch module).
    h_ref = jax.nn.sigmoid(x @ w1 + b1)
    out_ref = h_ref @ w2 + b2
    assert out.shape == (batch, number_of_classes)
    assert jnp.allclose(out, out_ref, atol=1e-5, rtol=1e-5)

    # Larger, non-multiple batch to exercise the multi-step grid + padding path.
    x_big = jax.random.normal(kx, (1024 + 24, input_size), jnp.float32)
    out_big = network_forward(x_big, w1, b1, w2, b2)
    jax.block_until_ready(out_big)
    out_big_ref = jax.nn.sigmoid(x_big @ w1 + b1) @ w2 + b2
    assert out_big.shape == (1024 + 24, number_of_classes)
    assert jnp.allclose(out_big, out_big_ref, atol=1e-5, rtol=1e-5)

    print("KERNEL_OK")
</pallas_src>

<mosaic_0001>
module attributes {stable_mosaic.version = 11 : i64} {
  func.func @_mlp_kernel(%arg0: i32, %arg1: memref<8x32xf32, #tpu.memory_space<vmem>>, %arg2: memref<32x256xf32, #tpu.memory_space<vmem>>, %arg3: memref<1x256xf32, #tpu.memory_space<vmem>>, %arg4: memref<256x128xf32, #tpu.memory_space<vmem>>, %arg5: memref<1x128xf32, #tpu.memory_space<vmem>>, %arg6: memref<8x128xf32, #tpu.memory_space<vmem>>) attributes {dimension_semantics = [#tpu.dimension_semantics<parallel>], iteration_bounds = array<i64: 1>, scalar_prefetch = 0 : i64, scratch_operands = 0 : i64, tpu.core_type = #tpu.core_type<tc>, window_params = [{transform_indices = @transform_0, window_bounds = array<i64: 8, 32>}, {pipeline_mode = #tpu.pipeline_mode<synchronous>, transform_indices = @transform_1, window_bounds = array<i64: 32, 256>}, {pipeline_mode = #tpu.pipeline_mode<synchronous>, transform_indices = @transform_2, window_bounds = array<i64: 1, 256>}, {pipeline_mode = #tpu.pipeline_mode<synchronous>, transform_indices = @transform_3, window_bounds = array<i64: 256, 128>}, {pipeline_mode = #tpu.pipeline_mode<synchronous>, transform_indices = @transform_4, window_bounds = array<i64: 1, 128>}, {transform_indices = @transform_5, window_bounds = array<i64: 8, 128>}]} {
    %c0 = arith.constant 0 : index
    %c0_0 = arith.constant 0 : index
    %0 = vector.load %arg1[%c0, %c0_0] : memref<8x32xf32, #tpu.memory_space<vmem>>, vector<8x32xf32>
    %c0_1 = arith.constant 0 : index
    %c0_2 = arith.constant 0 : index
    %1 = vector.load %arg2[%c0_1, %c0_2] : memref<32x256xf32, #tpu.memory_space<vmem>>, vector<32x256xf32>
    %cst = arith.constant dense<0.000000e+00> : vector<8x256xf32>
    %2 = tpu.matmul %0, %1, %cst {dimension_numbers = #tpu.dot_dimension_numbers<[1], [0], [0], [1], [0, 0, 1, 1], [], []>} : vector<8x32xf32>, vector<32x256xf32>, vector<8x256xf32> -> vector<8x256xf32>
    %c0_3 = arith.constant 0 : index
    %c0_4 = arith.constant 0 : index
    %3 = vector.load %arg3[%c0_3, %c0_4] : memref<1x256xf32, #tpu.memory_space<vmem>>, vector<1x256xf32>
    %4 = vector.broadcast %3 : vector<1x256xf32> to vector<8x256xf32>
    %5 = arith.addf %2, %4 : vector<8x256xf32>
    %6 = arith.negf %5 : vector<8x256xf32>
    %7 = math.exp %6 : vector<8x256xf32>
    %cst_5 = arith.constant 1.000000e+00 : f32
    %8 = vector.broadcast %cst_5 : f32 to vector<8x256xf32>
    %9 = arith.addf %8, %7 : vector<8x256xf32>
    %10 = arith.divf %8, %9 : vector<8x256xf32>
    %c0_6 = arith.constant 0 : index
    %c0_7 = arith.constant 0 : index
    %11 = vector.load %arg4[%c0_6, %c0_7] : memref<256x128xf32, #tpu.memory_space<vmem>>, vector<256x128xf32>
    %cst_8 = arith.constant dense<0.000000e+00> : vector<8x128xf32>
    %12 = tpu.matmul %10, %11, %cst_8 {dimension_numbers = #tpu.dot_dimension_numbers<[1], [0], [0], [1], [0, 0, 1, 1], [], []>} : vector<8x256xf32>, vector<256x128xf32>, vector<8x128xf32> -> vector<8x128xf32>
    %c0_9 = arith.constant 0 : index
    %c0_10 = arith.constant 0 : index
    %13 = vector.load %arg5[%c0_9, %c0_10] : memref<1x128xf32, #tpu.memory_space<vmem>>, vector<1x128xf32>
    %14 = vector.broadcast %13 : vector<1x128xf32> to vector<8x128xf32>
    %15 = arith.addf %12, %14 : vector<8x128xf32>
    %c0_11 = arith.constant 0 : index
    %c0_12 = arith.constant 0 : index
    %16 = vector.load %arg6[%c0_11, %c0_12] : memref<8x128xf32, #tpu.memory_space<vmem>>, vector<8x128xf32>
    tpu.vector_store %arg6[%c0_11, %c0_12], %15 {strides = array<i32>} : memref<8x128xf32, #tpu.memory_space<vmem>>, vector<8x128xf32>,
    return
  }
  func.func @transform_0(%arg0: i32) -> (i32, i32) {
    %c0_i32 = arith.constant 0 : i32
    %c0_i32_0 = arith.constant 0 : i32
    return %arg0, %c0_i32 : i32, i32
  }
  func.func @transform_1(%arg0: i32) -> (i32, i32) {
    %c0_i32 = arith.constant 0 : i32
    %c0_i32_0 = arith.constant 0 : i32
    %c0_i32_1 = arith.constant 0 : i32
    return %c0_i32, %c0_i32_0 : i32, i32
  }
  func.func @transform_2(%arg0: i32) -> (i32, i32) {
    %c0_i32 = arith.constant 0 : i32
    %c0_i32_0 = arith.constant 0 : i32
    %c0_i32_1 = arith.constant 0 : i32
    return %c0_i32, %c0_i32_0 : i32, i32
  }
  func.func @transform_3(%arg0: i32) -> (i32, i32) {
    %c0_i32 = arith.constant 0 : i32
    %c0_i32_0 = arith.constant 0 : i32
    %c0_i32_1 = arith.constant 0 : i32
    return %c0_i32, %c0_i32_0 : i32, i32
  }
  func.func @transform_4(%arg0: i32) -> (i32, i32) {
    %c0_i32 = arith.constant 0 : i32
    %c0_i32_0 = arith.constant 0 : i32
    %c0_i32_1 = arith.constant 0 : i32
    return %c0_i32, %c0_i32_0 : i32, i32
  }
  func.func @transform_5(%arg0: i32) -> (i32, i32) {
    %c0_i32 = arith.constant 0 : i32
    %c0_i32_0 = arith.constant 0 : i32
    return %arg0, %c0_i32 : i32, i32
  }
}

</mosaic_0001>

<bundles_post_ra>
// kernel: network_forward.1
= control target key start
LH: loop header
LB: loop body
LE: loop exit
PB: predicated region body
PF: predicated region fallthrough
CT: control target
= control target key end

     0   :  { %s414_s0 = inlined_call_operand.vmem [shape: f32[8,32], index: 0, kind: input, shape index: {}]   ;;  %s415_s1 = inlined_call_operand.vmem [shape: f32[32,256], index: 1, kind: input, shape index: {}]   ;;  %s416_s2 = inlined_call_operand.vmem [shape: f32[1,256], index: 2, kind: input, shape index: {}]   ;;  %s417_s3 = inlined_call_operand.vmem [shape: f32[256,128], index: 3, kind: input, shape index: {}]   ;;  %s418_s4 = inlined_call_operand.vmem [shape: f32[1,128], index: 4, kind: input, shape index: {}]   ;;  %s419_s5 = inlined_call_operand.hbm [shape: f32[8,128], index: 5, kind: output, shape index: {}]  }
   0x1   :  { %v28_v0 = vld [vmem:[%s415_s1 + $0x30] sm:$0xff]  ;;  %v29_v1 = vld [vmem:[%s415_s1 + $0x38] sm:$0xff]  ;;  %v26_v2 = vld [vmem:[%s415_s1 + $0x20] sm:$0xff] }
   0x2   :  { %52 = vmatpush.msra.mxu0 %v28_v0  ;;  %72 = vmatpush.msra.mxu1 %v29_v1  ;;  %v27_v3 = vld [vmem:[%s415_s1 + $0x28] sm:$0xff]  ;;  %v24_v4 = vld [vmem:[%s415_s1 + $0x10] sm:$0xff]  ;;  %v25_v5 = vld [vmem:[%s415_s1 + $0x18] sm:$0xff] }
   0x4   :  { %53 = vmatpush.msra.mxu0 %v26_v2  ;;  %73 = vmatpush.msra.mxu1 %v27_v3 }
   0x5   :  { %10 = vsyncpa [#allocation3], 0  ;;  %v22_v6 = vld [vmem:[%s415_s1] sm:$0xff]  ;;  %v23_v7 = vld [vmem:[%s415_s1 + $0x8] sm:$0xff]  ;;  %vm36_vm0 = vcmask 261120   ;;  %s251_s21 = smov [#allocation2]  }
   0x6   :  { %54 = vmatpush.msra.mxu0 %v24_v4  ;;  %74 = vmatpush.msra.mxu1 %v25_v5  ;;  %v21_v8 = vld [vmem:[%s414_s0] sm:$0xff]  ;;  %v133_v9 = vld [vmem:[%s417_s3 + $0x78] sm:$0xff]  ;;  %v132_v11 = vld [vmem:[%s417_s3 + $0x70] sm:$0xff]  ;;  %s200_s22 = sshll.u32 %s251_s21, 4  ;;  %s202_s25 = sshll.u32 %s419_s5, 4  ;;  %s201_s22 = int_to_ptr.vmem [resolvable:$true] %s200_s22  ;;  %s203_s25 = int_to_ptr.hbm [resolvable:$true] %s202_s25 }
   0x7   :  { %v149_v10 = vld [vmem:[%s417_s3 + $0xf8] sm:$0xff]  ;;  %154 = vmatpush.msra.mxu2 %v133_v9  ;;  %v148_v12 = vld [vmem:[%s417_s3 + $0xf0] sm:$0xff]  ;;  %v131_v13 = vld [vmem:[%s417_s3 + $0x68] sm:$0xff] }
   0x8   :  { %55 = vmatpush.msra.mxu0 %v22_v6  ;;  %75 = vmatpush.msra.mxu1 %v23_v7  ;;  %v147_v14 = vld [vmem:[%s417_s3 + $0xe8] sm:$0xff]  ;;  %v130_v15 = vld [vmem:[%s417_s3 + $0x60] sm:$0xff]  ;;  %v129_v17 = vld [vmem:[%s417_s3 + $0x58] sm:$0xff] }
   0x9   :  { %211 = vmatmul.msk.f32.vlgmr.msra.gmra.mxu0 %vm36_vm0, %v21_v8  ;;  %212 = vmatmul.msk.f32.vlgmr.msra.gmra.mxu1 %vm36_vm0, %v21_v8  ;;  %v146_v16 = vld [vmem:[%s417_s3 + $0xe0] sm:$0xff]  ;;  %v145_v18 = vld [vmem:[%s417_s3 + $0xd8] sm:$0xff]  ;;  %v128_v19 = vld [vmem:[%s417_s3 + $0x50] sm:$0xff] }
   0xa   :  { %174 = vmatpush.msra.mxu3 %v149_v10  ;;  %155 = vmatpush.msra.mxu2 %v132_v11  ;;  %v144_v20 = vld [vmem:[%s417_s3 + $0xd0] sm:$0xff]  ;;  %v127_v21 = vld [vmem:[%s417_s3 + $0x48] sm:$0xff]  ;;  %v126_v23 = vld [vmem:[%s417_s3 + $0x40] sm:$0xff] }
   0xb   :  { %v143_v22 = vld [vmem:[%s417_s3 + $0xc8] sm:$0xff]  ;;  %v142_v24 = vld [vmem:[%s417_s3 + $0xc0] sm:$0xff]  ;;  %v125_v25 = vld [vmem:[%s417_s3 + $0x38] sm:$0xff] }
   0xc   :  { %175 = vmatpush.msra.mxu3 %v148_v12  ;;  %156 = vmatpush.msra.mxu2 %v131_v13  ;;  %v141_v26 = vld [vmem:[%s417_s3 + $0xb8] sm:$0xff]  ;;  %v124_v27 = vld [vmem:[%s417_s3 + $0x30] sm:$0xff]  ;;  %v123_v29 = vld [vmem:[%s417_s3 + $0x28] sm:$0xff] }
   0xd   :  { %v140_v28 = vld [vmem:[%s417_s3 + $0xb0] sm:$0xff]  ;;  %v139_v30 = vld [vmem:[%s417_s3 + $0xa8] sm:$0xff]  ;;  %v122_v31 = vld [vmem:[%s417_s3 + $0x20] sm:$0xff] }
   0xe   :  { %176 = vmatpush.msra.mxu3 %v147_v14  ;;  %157 = vmatpush.msra.mxu2 %v130_v15  ;;  %v138_v32 = vld [vmem:[%s417_s3 + $0xa0] sm:$0xff]  ;;  %v121_v33 = vld [vmem:[%s417_s3 + $0x18] sm:$0xff]  ;;  %v120_v35 = vld [vmem:[%s417_s3 + $0x10] sm:$0xff] }
   0xf   :  { %v137_v34 = vld [vmem:[%s417_s3 + $0x98] sm:$0xff]  ;;  %v136_v36 = vld [vmem:[%s417_s3 + $0x90] sm:$0xff]  ;;  %v30_v37 = vld [vmem:[%s416_s2] sm:$0x3] }
  0x10   :  { %177 = vmatpush.msra.mxu3 %v146_v16  ;;  %158 = vmatpush.msra.mxu2 %v129_v17  ;;  %v119_v38 = vld [vmem:[%s417_s3 + $0x8] sm:$0xff]  ;;  %v118_v40 = vld [vmem:[%s417_s3] sm:$0xff]  ;;  %v32_v42 = vperm.slane %v30_v37, 0  ;;  %v33_v43 = vperm.slane %v30_v37, 1 }
  0x11   :  { %v135_v39 = vld [vmem:[%s417_s3 + $0x88] sm:$0xff]  ;;  %v134_v41 = vld [vmem:[%s417_s3 + $0x80] sm:$0xff] }
  0x12   :  { %178 = vmatpush.msra.mxu3 %v145_v18  ;;  %159 = vmatpush.msra.mxu2 %v128_v19  ;;  %v216_v10 = vld [vmem:[%s418_s4] ss:$0 sm:$0xff] }
  0x14   :  { %179 = vmatpush.msra.mxu3 %v144_v20  ;;  %160 = vmatpush.msra.mxu2 %v127_v21 }
  0x16   :  { %180 = vmatpush.msra.mxu3 %v143_v22  ;;  %161 = vmatpush.msra.mxu2 %v126_v23 }
  0x18   :  { %181 = vmatpush.msra.mxu3 %v142_v24  ;;  %162 = vmatpush.msra.mxu2 %v125_v25 }
  0x1a   :  { %182 = vmatpush.msra.mxu3 %v141_v26  ;;  %163 = vmatpush.msra.mxu2 %v124_v27 }
  0x1c   :  { %183 = vmatpush.msra.mxu3 %v140_v28  ;;  %164 = vmatpush.msra.mxu2 %v123_v29 }
  0x1e   :  { %184 = vmatpush.msra.mxu3 %v139_v30  ;;  %165 = vmatpush.msra.mxu2 %v122_v31 }
  0x20   :  { %185 = vmatpush.msra.mxu3 %v138_v32  ;;  %166 = vmatpush.msra.mxu2 %v121_v33 }
  0x22   :  { %186 = vmatpush.msra.mxu3 %v137_v34  ;;  %167 = vmatpush.msra.mxu2 %v120_v35 }
  0x24   :  { %187 = vmatpush.msra.mxu3 %v136_v36  ;;  %168 = vmatpush.msra.mxu2 %v119_v38 }
  0x26   :  { %188 = vmatpush.msra.mxu3 %v135_v39  ;;  %169 = vmatpush.msra.mxu2 %v118_v40 }
  0x28   :  { %189 = vmatpush.msra.mxu3 %v134_v41 }
  0x86   :  { %v57_v44 = vpop.f32.mrf.mxu0  ;;  %v77_v45 = vpop.f32.mrf.mxu1 }
  0x87   :  { %v58_v46 = vadd.f32 %v57_v44, %v32_v42  ;;  %v78_v47 = vadd.f32 %v77_v45, %v33_v43 }
  0x89   :  { %v213_v48 = vmul.f32 -1.442695, %v58_v46  ;;  %v214_v49 = vmul.f32 -1.442695, %v78_v47 }
  0x8b   :  { %217 = vpow2.f32 %v213_v48 }
  0x8c   :  { %219 = vpow2.f32 %v214_v49 }
  0x91   :  { %v218_v50 = vpop.eup %217 }
  0x92   :  { %v220_v51 = vpop.eup %219  ;;  %v86_v52 = vadd.f32 1.0, %v218_v50 }
  0x93   :  { %v87_v53 = vadd.f32 1.0, %v220_v51 }
  0x94   :  { %221 = vrcp.f32 %v86_v52  ;;  %v99_v59 = vand.u32 2147483648, %v86_v52  ;;  %v97_v62 = vand.u32 2147483647, %v86_v52  ;;  %vm93_vm3 = vweird.f32 %v86_v52 }
  0x95   :  { %223 = vrcp.f32 %v87_v53  ;;  %v114_v63 = vand.u32 2147483648, %v87_v53  ;;  %v112_v1 = vand.u32 2147483647, %v87_v53  ;;  %vm108_vm5 = vweird.f32 %v87_v53 }
  0x96   :  { %v100_v3 = vor.u32 1.1754944e-38, %v99_v59  ;;  %vm98_vm6 = vcmp.eq.f32.partialorder %v97_v62, 8.507059e+37 }
  0x97   :  { %v115_v6 = vor.u32 1.1754944e-38, %v114_v63  ;;  %vm113_vm8 = vcmp.eq.f32.partialorder %v112_v1, 8.507059e+37 }
  0x9a   :  { %v222_v54 = vpop.eup %221 }
  0x9b   :  { %v224_v55 = vpop.eup %223  ;;  %v89_v56 = vmul.f32 %v222_v54, %v86_v52  ;;  %vm94_vm1 = vweird.f32 %v222_v54 }
  0x9c   :  { %v104_v57 = vmul.f32 %v224_v55, %v87_v53  ;;  %vm109_vm2 = vweird.f32 %v224_v55  ;;  %vm95_vm4 = vmor %vm93_vm3, %vm94_vm1 }
  0x9d   :  { %v90_v58 = vsub.f32 1.0, %v89_v56  ;;  %vm110_vm7 = vmor %vm108_vm5, %vm109_vm2 }
  0x9e   :  { %v105_v60 = vsub.f32 1.0, %v104_v57 }
  0x9f   :  { %v91_v61 = vmul.f32 %v222_v54, %v90_v58 }
  0xa0   :  { %v106_v0 = vmul.f32 %v224_v55, %v105_v60 }
  0xa1   :  { %v92_v2 = vadd.f32 %v222_v54, %v91_v61 }
  0xa2   :  { %v107_v4 = vadd.f32 %v224_v55, %v106_v0 }
  0xa3   :  { %v96_v5 = vsel %vm95_vm4, %v222_v54, %v92_v2 }
  0xa4   :  { %v101_v7 = vsel %vm98_vm6, %v100_v3, %v96_v5  ;;  %v111_v8 = vsel %vm110_vm7, %v224_v55, %v107_v4 }
  0xa5   :  { %170 = vmatmul.f32.vlgmr.msra.gmra.mxu2 %v101_v7  ;;  %v116_v9 = vsel %vm113_vm8, %v115_v6, %v111_v8 }
  0xa6   :  { %190 = vmatmul.f32.vlgmr.msra.gmra.mxu3 %v116_v9 }
 0x128   :  { %v171_v11 = vpop.f32.mrf.mxu2 }
 0x129   :  { %v172_v12 = vadd.f32 %v216_v10, %v171_v11  ;;  %v191_v13 = vpop.f32.mrf.mxu3 }
 0x12b   :  { %v192_v14 = vadd.f32 %v191_v13, %v172_v12 }
 0x12d   :  { %194 = vst [vmem:[#allocation2] sm:$0xff] %v192_v14 }
 0x12e   :  { %205 = dma.vmem_to_hbm [thread:$0]  %s201_s22, 128, %s203_s25, [#allocation3]  }
 0x12f   :  { %249 = dma.done.wait [#allocation3], 128  }
 0x130   :  { %250 = vsyncadd [#allocation3], 4294967168 }
 0x131   :  { %210 = vsyncpa [#allocation3], 1 }

</bundles_post_ra>
